<compile_context>
chip_gen: v7x
topology: tpu7x:2x2x1
jax: 0.10.0
libtpu: 0.0.40
codegen_flags: <defaults>
</compile_context>

<pallas_src>
import math

import jax
import jax.numpy as jnp
from jax import lax
from jax.experimental import pallas as pl
from jax.experimental.pallas import tpu as pltpu


def _round_up(a, b):
    return (a + b - 1) // b * b


def _vmem_capacity_bytes():
    try:
        return int(pltpu.get_tpu_info().vmem_capacity_bytes)
    except Exception:
        # Conservative fallback (v7x-sized); only affects tile selection, not correctness.
        return 64 * 1024 * 1024


def _choose_blocks(M, dim1, dim2, rank_p, x_isz, w_isz, h_isz, o_isz, m_align, vmem_cap):
    """Pick the largest (block_m, block_n) whose pipeline buffers fit ~70% of VMEM."""
    budget = int(vmem_cap * 0.70)
    vt_bytes = rank_p * dim2 * w_isz  # single-buffered (pl.Buffered(1))

    m_cap = _round_up(max(M, 1), m_align)
    n_cap = _round_up(max(dim1, 1), 128)
    # Prefer 256-granular tiles (v6e/v7x MXU is 2x256x256); fall back to smaller for small dims.
    m_cands = sorted({min(c, m_cap) for c in (1024, 512, 256, 128, 64, 32, 16, 8)}, reverse=True)
    n_cands = sorted({min(c, n_cap) for c in (1024, 512, 256, 128)}, reverse=True)

    def need(bm, bn):
        return (vt_bytes
                + 2 * bm * dim2 * x_isz        # x tile, double-buffered
                + 2 * bn * rank_p * w_isz      # U tile, double-buffered
                + 2 * bn * w_isz               # bias tile
                + 2 * bm * bn * o_isz          # output tile, double-buffered
                + bm * rank_p * h_isz)         # h scratch

    for bm in m_cands:
        for bn in n_cands:
            n = need(bm, bn)
            if n <= budget:
                return bm, bn, n
    bm, bn = m_cands[-1], n_cands[-1]
    return bm, bn, need(bm, bn)


def _factorized_linear_kernel(x_ref, vt_ref, u_ref, b_ref, o_ref, h_ref):
    # x_ref : (block_m, dim2)
    # vt_ref: (rank_p, dim2)     -- resident, single-buffered (constant index_map)
    # u_ref : (block_n, rank_p)
    # b_ref : (1, block_n)
    # o_ref : (block_m, block_n)
    # h_ref : (block_m, rank_p)  -- VMEM scratch in compute dtype (bf16 if x is bf16)
    j = pl.program_id(1)

    # h = x @ VT^T, computed (and cast) once per M tile; the inner N axis is sequential.
    @pl.when(j == 0)
    def _():
        h = lax.dot_general(
            x_ref[...], vt_ref[...],
            dimension_numbers=(((1,), (1,)), ((), ())),   # contract last dims, no transpose
            preferred_element_type=jnp.float32)
        h_ref[...] = h.astype(h_ref.dtype)

    # y = h @ U^T + bias for this (M, N) tile; accumulate in f32.
    y = lax.dot_general(
        h_ref[...], u_ref[...],
        dimension_numbers=(((1,), (1,)), ((), ())),
        preferred_element_type=jnp.float32)
    o_ref[...] = (y + b_ref[...].astype(jnp.float32)).astype(o_ref.dtype)


def factorized_linear(x, U, VT, bias, *, rank_align=128):
    """Pallas TPU implementation of FactorizedLinear.forward."""
    M, dim2 = x.shape
    dim1, rank = U.shape
    assert VT.shape == (rank, dim2)
    assert bias.shape == (dim1,)

    # Compute / weight dtype follows x: pure-bf16 MXU path when x is bf16, f32 otherwise.
    w_dtype = x.dtype
    h_dtype = jnp.bfloat16 if x.dtype == jnp.bfloat16 else jnp.float32
    x_isz = jnp.dtype(x.dtype).itemsize
    w_isz = jnp.dtype(w_dtype).itemsize
    h_isz = jnp.dtype(h_dtype).itemsize
    o_isz = x_isz

    # --- MXU / lane-friendly padding (zero padding is numerically exact) ---
    rank_p = _round_up(max(rank, 1), rank_align)
    m_align = 16 if x_isz < 4 else 8   # bf16 packs two rows per sublane

    vmem_cap = _vmem_capacity_bytes()
    block_m, block_n, buf_bytes = _choose_blocks(
        M, dim1, dim2, rank_p, x_isz, w_isz, h_isz, o_isz, m_align, vmem_cap)

    M_p = _round_up(M, block_m)
    dim1_p = _round_up(dim1, block_n)

    x_p = x if M_p == M else jnp.pad(x, ((0, M_p - M), (0, 0)))
    VT_p = VT if rank_p == rank else jnp.pad(VT, ((0, rank_p - rank), (0, 0)))
    U_p = U
    if rank_p != rank or dim1_p != dim1:
        U_p = jnp.pad(U, ((0, dim1_p - dim1), (0, rank_p - rank)))
    bias_p = bias if dim1_p == dim1 else jnp.pad(bias, (0, dim1_p - dim1))

    VT_p = VT_p.astype(w_dtype)
    U_p = U_p.astype(w_dtype)
    bias2d = bias_p.reshape(1, dim1_p).astype(w_dtype)

    grid = (M_p // block_m, dim1_p // block_n)

    vmem_limit = min(int(vmem_cap * 0.90), max(buf_bytes + (8 << 20), 32 << 20))

    cost = pl.CostEstimate(
        flops=2 * M * rank * (dim2 + dim1),
        transcendentals=0,
        bytes_accessed=(x.size * x_isz + VT.size * w_isz + U.size * w_isz
                        + bias.size * w_isz + M * dim1 * o_isz))

    out_p = pl.pallas_call(
        _factorized_linear_kernel,
        out_shape=jax.ShapeDtypeStruct((M_p, dim1_p), x.dtype),
        grid_spec=pltpu.PrefetchScalarGridSpec(
            num_scalar_prefetch=0,
            grid=grid,
            in_specs=[
                pl.BlockSpec((block_m, dim2), lambda i, j: (i, 0)),     # x tile
                pl.BlockSpec((rank_p, dim2), lambda i, j: (0, 0),
                             pipeline_mode=pl.Buffered(1)),             # VT (resident, 1 copy)
                pl.BlockSpec((block_n, rank_p), lambda i, j: (j, 0)),   # U tile
                pl.BlockSpec((1, block_n), lambda i, j: (0, j)),        # bias tile
            ],
            out_specs=pl.BlockSpec((block_m, block_n), lambda i, j: (i, j)),
            scratch_shapes=[pltpu.VMEM((block_m, rank_p), h_dtype)],
        ),
        compiler_params=pltpu.CompilerParams(
            dimension_semantics=("parallel", "arbitrary"),
            vmem_limit_bytes=vmem_limit),
        cost_estimate=cost,
    )(x_p, VT_p, U_p, bias2d)

    if M_p == M and dim1_p == dim1:
        return out_p
    return out_p[:M, :dim1]


def spectral_init(weight, rank):
    """JAX equivalent of the PyTorch spectral_init: returns (U, VT) factors."""
    Usvd, S, Vh = jnp.linalg.svd(weight, full_matrices=False)
    V = Vh.T
    sqrtS = jnp.diag(jnp.sqrt(S[:rank]))
    Ufac = Usvd[:, :rank] @ sqrtS                  # (dim1, rank)
    VTfac = (V[:, :rank] @ sqrtS).T                # (rank, dim2)
    return Ufac, VTfac


def make_factorized_linear_params(key, dim1, dim2, rank_scale=1.0):
    """Deterministically build the params FactorizedLinear.__init__ would hold."""
    rank = int(round(rank_scale * min(dim1, dim2)))
    kw, kb = jax.random.split(key)
    bound_w = 1.0 / math.sqrt(dim2)
    weight = jax.random.uniform(kw, (dim1, dim2), jnp.float32, -bound_w, bound_w)
    bias = jax.random.uniform(kb, (dim1,), jnp.float32, -bound_w, bound_w)
    Ufac, VTfac = spectral_init(weight, rank)
    U = jnp.zeros((dim1, rank), jnp.float32).at[:, :Ufac.shape[1]].set(Ufac)
    VT = jnp.zeros((rank, dim2), jnp.float32).at[:VTfac.shape[0], :].set(VTfac)
    return U, VT, bias


if __name__ == "__main__":
    key = jax.random.PRNGKey(0)
    kparam, kx = jax.random.split(key)

    batch = 8
    in_features = 32    # dim2
    out_features = 32   # dim1
    rank_scale = 0.5

    U, VT, bias = make_factorized_linear_params(
        kparam, out_features, in_features, rank_scale=rank_scale)

    x = jax.random.normal(kx, (batch, in_features), jnp.float32)

    y = factorized_linear(x, U, VT, bias)
    y = jax.block_until_ready(y)

    # Reference check: same math as F.linear(F.linear(x, VT), U, bias).
    y_ref = (x @ VT.T) @ U.T + bias[None, :]
    assert y.shape == (batch, out_features)
    assert jnp.allclose(y, y_ref, atol=1e-4, rtol=1e-4)

    print("KERNEL_OK")
</pallas_src>

<mosaic_0001>
module attributes {stable_mosaic.version = 11 : i64} {
  func.func @_factorized_linear_kernel(%arg0: i32, %arg1: i32, %arg2: memref<8x32xf32, #tpu.memory_space<vmem>>, %arg3: memref<128x32xf32, #tpu.memory_space<vmem>>, %arg4: memref<128x128xf32, #tpu.memory_space<vmem>>, %arg5: memref<1x128xf32, #tpu.memory_space<vmem>>, %arg6: memref<8x128xf32, #tpu.memory_space<vmem>>, %arg7: memref<8x128xf32, #tpu.memory_space<vmem>>) attributes {dimension_semantics = [#tpu.dimension_semantics<parallel>, #tpu.dimension_semantics<arbitrary>], iteration_bounds = array<i64: 1, 1>, scalar_prefetch = 0 : i64, scratch_operands = 1 : i64, tpu.core_type = #tpu.core_type<tc>, window_params = [{transform_indices = @transform_0, window_bounds = array<i64: 8, 32>}, {pipeline_mode = #tpu.pipeline_mode<synchronous>, transform_indices = @transform_1, window_bounds = array<i64: 128, 32>}, {transform_indices = @transform_2, window_bounds = array<i64: 128, 128>}, {transform_indices = @transform_3, window_bounds = array<i64: 1, 128>}, {transform_indices = @transform_4, window_bounds = array<i64: 8, 128>}]} {
    %c0_i32 = arith.constant 0 : i32
    %0 = arith.cmpi eq, %arg1, %c0_i32 : i32
    %1 = arith.extui %0 : i1 to i32
    %c0_i32_0 = arith.constant 0 : i32
    %2 = arith.cmpi ne, %1, %c0_i32_0 : i32
    scf.if %2 {
      %c0_8 = arith.constant 0 : index
      %c0_9 = arith.constant 0 : index
      %10 = vector.load %arg2[%c0_8, %c0_9] : memref<8x32xf32, #tpu.memory_space<vmem>>, vector<8x32xf32>
      %c0_10 = arith.constant 0 : index
      %c0_11 = arith.constant 0 : index
      %11 = vector.load %arg3[%c0_10, %c0_11] : memref<128x32xf32, #tpu.memory_space<vmem>>, vector<128x32xf32>
      %cst_12 = arith.constant dense<0.000000e+00> : vector<8x128xf32>
      %12 = tpu.matmul %10, %11, %cst_12 {dimension_numbers = #tpu.dot_dimension_numbers<[1], [1], [0], [0], [0, 0, 1, 0], [], []>} : vector<8x32xf32>, vector<128x32xf32>, vector<8x128xf32> -> vector<8x128xf32>
      %c0_13 = arith.constant 0 : index
      %c0_14 = arith.constant 0 : index
      %13 = vector.load %arg7[%c0_13, %c0_14] : memref<8x128xf32, #tpu.memory_space<vmem>>, vector<8x128xf32>
      tpu.vector_store %arg7[%c0_13, %c0_14], %12 {strides = array<i32>} : memref<8x128xf32, #tpu.memory_space<vmem>>, vector<8x128xf32>,
    } else {
    }
    %c0 = arith.constant 0 : index
    %c0_1 = arith.constant 0 : index
    %3 = vector.load %arg7[%c0, %c0_1] : memref<8x128xf32, #tpu.memory_space<vmem>>, vector<8x128xf32>
    %c0_2 = arith.constant 0 : index
    %c0_3 = arith.constant 0 : index
    %4 = vector.load %arg4[%c0_2, %c0_3] : memref<128x128xf32, #tpu.memory_space<vmem>>, vector<128x128xf32>
    %cst = arith.constant dense<0.000000e+00> : vector<8x128xf32>
    %5 = tpu.matmul %3, %4, %cst {dimension_numbers = #tpu.dot_dimension_numbers<[1], [1], [0], [0], [0, 0, 1, 0], [], []>} : vector<8x128xf32>, vector<128x128xf32>, vector<8x128xf32> -> vector<8x128xf32>
    %c0_4 = arith.constant 0 : index
    %c0_5 = arith.constant 0 : index
    %6 = vector.load %arg5[%c0_4, %c0_5] : memref<1x128xf32, #tpu.memory_space<vmem>>, vector<1x128xf32>
    %7 = vector.broadcast %6 : vector<1x128xf32> to vector<8x128xf32>
    %8 = arith.addf %5, %7 : vector<8x128xf32>
    %c0_6 = arith.constant 0 : index
    %c0_7 = arith.constant 0 : index
    %9 = vector.load %arg6[%c0_6, %c0_7] : memref<8x128xf32, #tpu.memory_space<vmem>>, vector<8x128xf32>
    tpu.vector_store %arg6[%c0_6, %c0_7], %8 {strides = array<i32>} : memref<8x128xf32, #tpu.memory_space<vmem>>, vector<8x128xf32>,
    return
  }
  func.func @transform_0(%arg0: i32, %arg1: i32) -> (i32, i32) {
    %c0_i32 = arith.constant 0 : i32
    %c0_i32_0 = arith.constant 0 : i32
    return %arg0, %c0_i32 : i32, i32
  }
  func.func @transform_1(%arg0: i32, %arg1: i32) -> (i32, i32) {
    %c0_i32 = arith.constant 0 : i32
    %c0_i32_0 = arith.constant 0 : i32
    %c0_i32_1 = arith.constant 0 : i32
    return %c0_i32, %c0_i32_0 : i32, i32
  }
  func.func @transform_2(%arg0: i32, %arg1: i32) -> (i32, i32) {
    %c0_i32 = arith.constant 0 : i32
    %c0_i32_0 = arith.constant 0 : i32
    return %arg1, %c0_i32 : i32, i32
  }
  func.func @transform_3(%arg0: i32, %arg1: i32) -> (i32, i32) {
    %c0_i32 = arith.constant 0 : i32
    %c0_i32_0 = arith.constant 0 : i32
    return %c0_i32, %arg1 : i32, i32
  }
  func.func @transform_4(%arg0: i32, %arg1: i32) -> (i32, i32) {
    %c0_i32 = arith.constant 0 : i32
    return %arg0, %arg1 : i32, i32
  }
}

</mosaic_0001>

<bundles_post_ra>
// kernel: tpu_custom_call.1
= control target key start
LH: loop header
LB: loop body
LE: loop exit
PB: predicated region body
PF: predicated region fallthrough
CT: control target
= control target key end

     0   :  { %vm39_vm0 = vcmask 261120   ;;  %v477_v2 = vmov 0.0|0.0   ;;  %vm478_vm2 = vmmov 0   ;;  %v479_v5 = vmov 0.0   ;;  %s659_s0 = inlined_call_operand.vmem [shape: f32[8,32], index: 0, kind: input, shape index: {}]   ;;  %s660_s1 = inlined_call_operand.vmem [shape: f32[128,32], index: 1, kind: input, shape index: {}]   ;;  %s661_s2 = inlined_call_operand.vmem [shape: f32[128,128], index: 2, kind: input, shape index: {}]   ;;  %s662_s3 = inlined_call_operand.vmem [shape: f32[1,128], index: 3, kind: input, shape index: {}]   ;;  %s663_s4 = inlined_call_operand.hbm [shape: f32[8,128], index: 4, kind: output, shape index: {}]  }
   0x1   :  { %v23_v0 = vld [vmem:[%s660_s1] sm:$0xff]  ;;  %v24_v1 = vld [vmem:[%s660_s1 + $0x8] sm:$0xff]  ;;  %393 = vmatprep.subr.bf16.mxu0 %v477_v2  ;;  %vm515_vm1 = vmpackc.low %vm39_vm0, %vm39_vm0  ;;  %425 = vmatprep.subr.bf16.mxu1 %v477_v2 }
   0x2   :  { %v394_v3 = vpack.c.bf16 %v24_v1, %v23_v0  ;;  %355 = vmatprep.mubr.msk.f32.mxu0 %vm478_vm2, %v479_v5  ;;  %390 = vmatprep.mubr.msk.f32.mxu1 %vm478_vm2, %v479_v5  ;;  %v25_v6 = vld [vmem:[%s660_s1 + $0x10] sm:$0xff]  ;;  %v26_v7 = vld [vmem:[%s660_s1 + $0x18] sm:$0xff]  ;;  %v163_v8 = vld [vmem:[%s661_s2] sm:$0xff] }
   0x3   :  { %v164_v9 = vld [vmem:[%s661_s2 + $0x8] sm:$0xff]  ;;  %v398_v10 = vpack.c.bf16 %v26_v7, %v25_v6  ;;  %v165_v12 = vld [vmem:[%s661_s2 + $0x10] sm:$0xff]  ;;  %v166_v13 = vld [vmem:[%s661_s2 + $0x18] sm:$0xff] }
   0x4   :  { %396 = vmatpush3.bf16.xpose.msk.msra.mxu0 %vm515_vm1, %v394_v3  ;;  %v426_v11 = vpack.c.bf16 %v164_v9, %v163_v8 }
   0x5   :  { %397 = vmatprep.subr.bf16.mxu0 %v477_v2 }
   0x6   :  { %427 = vmatpush3.bf16.xpose.msra.mxu1 %v426_v11 }
   0x7   :  { %428 = vmatprep.subr.bf16.mxu1 %v477_v2 }
   0xc   :  { %400 = vmatpush3.bf16.xpose.msk.msra.mxu0 %vm515_vm1, %v398_v10 }
   0xd   :  { %9 = vsyncpa [#allocation4], 0  ;;  %401 = vmatprep.subr.bf16.mxu0 %v477_v2  ;;  %v27_v14 = vld [vmem:[%s660_s1 + $0x20] sm:$0xff]  ;;  %v28_v15 = vld [vmem:[%s660_s1 + $0x28] sm:$0xff]  ;;  %v429_v16 = vpack.c.bf16 %v166_v13, %v165_v12  ;;  %s480_s30 = smov [#allocation3]  }
   0xe   :  { %v402_v17 = vpack.c.bf16 %v28_v15, %v27_v14  ;;  %v167_v18 = vld [vmem:[%s661_s2 + $0x20] sm:$0xff]  ;;  %v168_v19 = vld [vmem:[%s661_s2 + $0x28] sm:$0xff]  ;;  %v29_v20 = vld [vmem:[%s660_s1 + $0x30] sm:$0xff] }
   0xf   :  { %430 = vmatpush3.bf16.xpose.msra.mxu1 %v429_v16  ;;  %v30_v21 = vld [vmem:[%s660_s1 + $0x38] sm:$0xff]  ;;  %v432_v22 = vpack.c.bf16 %v168_v19, %v167_v18  ;;  %v169_v24 = vld [vmem:[%s661_s2 + $0x30] sm:$0xff]  ;;  %v31_v26 = vld [vmem:[%s660_s1 + $0x40] sm:$0xff] }
  0x10   :  { %431 = vmatprep.subr.bf16.mxu1 %v477_v2  ;;  %v406_v23 = vpack.c.bf16 %v30_v21, %v29_v20  ;;  %v170_v25 = vld [vmem:[%s661_s2 + $0x38] sm:$0xff]  ;;  %v32_v27 = vld [vmem:[%s660_s1 + $0x48] sm:$0xff]  ;;  %v171_v30 = vld [vmem:[%s661_s2 + $0x40] sm:$0xff] }
  0x11   :  { %v435_v28 = vpack.c.bf16 %v170_v25, %v169_v24  ;;  %v410_v29 = vpack.c.bf16 %v32_v27, %v31_v26  ;;  %v172_v31 = vld [vmem:[%s661_s2 + $0x48] sm:$0xff]  ;;  %v33_v32 = vld [vmem:[%s660_s1 + $0x50] sm:$0xff]  ;;  %v34_v33 = vld [vmem:[%s660_s1 + $0x58] sm:$0xff] }
  0x12   :  { %v438_v34 = vpack.c.bf16 %v172_v31, %v171_v30  ;;  %v414_v35 = vpack.c.bf16 %v34_v33, %v33_v32  ;;  %v173_v36 = vld [vmem:[%s661_s2 + $0x50] sm:$0xff]  ;;  %v174_v37 = vld [vmem:[%s661_s2 + $0x58] sm:$0xff]  ;;  %v35_v38 = vld [vmem:[%s660_s1 + $0x60] sm:$0xff] }
  0x13   :  { %v36_v39 = vld [vmem:[%s660_s1 + $0x68] sm:$0xff]  ;;  %v441_v40 = vpack.c.bf16 %v174_v37, %v173_v36  ;;  %v175_v42 = vld [vmem:[%s661_s2 + $0x60] sm:$0xff]  ;;  %v37_v44 = vld [vmem:[%s660_s1 + $0x70] sm:$0xff] }
  0x14   :  { %404 = vmatpush3.bf16.xpose.msk.msra.mxu0 %vm515_vm1, %v402_v17  ;;  %v418_v41 = vpack.c.bf16 %v36_v39, %v35_v38  ;;  %v176_v43 = vld [vmem:[%s661_s2 + $0x68] sm:$0xff]  ;;  %v38_v45 = vld [vmem:[%s660_s1 + $0x78] sm:$0xff]  ;;  %v177_v48 = vld [vmem:[%s661_s2 + $0x70] sm:$0xff] }
  0x15   :  { %405 = vmatprep.subr.bf16.mxu0 %v477_v2  ;;  %v444_v46 = vpack.c.bf16 %v176_v43, %v175_v42  ;;  %v422_v47 = vpack.c.bf16 %v38_v45, %v37_v44  ;;  %v178_v49 = vld [vmem:[%s661_s2 + $0x78] sm:$0xff]  ;;  %v22_v51 = vld [vmem:[%s659_s0] sm:$0xff]  ;;  %s263_s2 = sshll.u32 %s480_s30, 4  ;;  %s264_s2 = int_to_ptr.vmem [resolvable:$true] %s263_s2 }
  0x16   :  { %v447_v50 = vpack.c.bf16 %v178_v49, %v177_v48  ;;  %v288_v54 = vld [vmem:[%s662_s3] ss:$0 sm:$0xff]  ;;  %s453_s5 = scalar_lea.vmem %s264_s2, 128  ;;  %p458_p1 = scmp.lt.s32.totalorder %s264_s2, %s264_s2 }
  0x17   :  { %433 = vmatpush3.bf16.xpose.msra.mxu1 %v432_v22  ;;  %p454_p0 = scmp.ne.s32.totalorder %s264_s2, %s453_s5  ;;  %p459_p2 = scmp.lt.s32.totalorder %s453_s5, %s453_s5 }
  0x18   :  { %434 = vmatprep.subr.bf16.mxu1 %v477_v2 }
  0x19   :  { %p460_p3 = por %p459_p2, %p458_p1 }
  0x1b   :  { %p461_p4 = pnand %p460_p3, %p454_p0 }
  0x1c   :  { %408 = vmatpush3.bf16.xpose.msk.msra.mxu0 %vm515_vm1, %v406_v23 }
  0x1d   :  { %409 = vmatprep.subr.bf16.mxu0 %v477_v2 }
  0x1f   :  { %436 = vmatpush3.bf16.xpose.msra.mxu1 %v435_v28 }
  0x20   :  { %437 = vmatprep.subr.bf16.mxu1 %v477_v2 }
  0x24   :  { %412 = vmatpush3.bf16.xpose.msk.msra.mxu0 %vm515_vm1, %v410_v29 }
  0x25   :  { %413 = vmatprep.subr.bf16.mxu0 %v477_v2 }
  0x27   :  { %439 = vmatpush3.bf16.xpose.msra.mxu1 %v438_v34 }
  0x28   :  { %440 = vmatprep.subr.bf16.mxu1 %v477_v2 }
  0x2c   :  { %416 = vmatpush3.bf16.xpose.msk.msra.mxu0 %vm515_vm1, %v414_v35 }
  0x2d   :  { %417 = vmatprep.subr.bf16.mxu0 %v477_v2 }
  0x2f   :  { %442 = vmatpush3.bf16.xpose.msra.mxu1 %v441_v40 }
  0x30   :  { %443 = vmatprep.subr.bf16.mxu1 %v477_v2 }
  0x34   :  { %420 = vmatpush3.bf16.xpose.msk.msra.mxu0 %vm515_vm1, %v418_v41 }
  0x35   :  { %421 = vmatprep.subr.bf16.mxu0 %v477_v2 }
  0x37   :  { %445 = vmatpush3.bf16.xpose.msra.mxu1 %v444_v46 }
  0x38   :  { %446 = vmatprep.subr.bf16.mxu1 %v477_v2 }
  0x3c   :  { %424 = vmatpush3.bf16.xpose.msk.msra.mxu0 %vm515_vm1, %v422_v47 }
  0x3f   :  { %448 = vmatpush3.bf16.xpose.msra.mxu1 %v447_v50 }
  0x43   :  { %356 = vmatmul.mubr.msk.f32.vlgmr.msra.gmra.mrb[0].mxu0 %vm39_vm0, %v22_v51 }
 0x116   :  { %v157_v52 = vpop.f32.mrb[0].mxu0 }
 0x117   :  { %v357_v53 = vpop.f32.mrb[1].mxu0  ;;  %391 = vmatmul.mubr.f32.vlgmr.msra.gmra.mrb[0].mxu1 %v157_v52 }
 0x1ea   :  { %v252_v55 = vpop.f32.mrb[0].mxu1 }
 0x1eb   :  { %v253_v56 = vadd.f32 %v288_v54, %v252_v55  ;;  %v392_v57 = vpop.f32.mrb[1].mxu1 }
 0x1ed   :  { %256 = vst [vmem:[#allocation3] sm:$0xff] %v253_v56 }
 0x1ee   :  { %464 = shalt.err (!%p461_p4)
}
 0x1ef   :  { %s465_s7 = scalar_lea.hbm %s663_s4, 128 }
 0x1f0   :  { %p466_p5 = scmp.ne.s32.totalorder %s663_s4, %s465_s7  ;;  %p469_p6 = scmp.lt.u32.totalorder %s465_s7, %s663_s4 }
 0x1f2   :  { %p471_p7 = pnand %p469_p6, %p466_p5 }
 0x1f4   :  { %474 = shalt.err (!%p471_p7)
}
 0x1f5   :  { %266 = dma.vmem_to_hbm [thread:$0]  %s264_s2, 128, %s663_s4, [#allocation4]  }
 0x1f6   :  { %475 = dma.done.wait [#allocation4], 128  }
 0x1f7   :  { %476 = vsyncadd [#allocation4], 4294967168 }
 0x1f8   :  { %270 = vsyncpa [#allocation4], 1 }

</bundles_post_ra>
